<compile_context>
chip_gen: v7x
topology: tpu7x:2x2x1
jax: 0.10.0
libtpu: 0.0.40
codegen_flags: <defaults>
</compile_context>

<pallas_src>
import math
import functools

import jax
import jax.numpy as jnp
from jax import lax
from jax.experimental import pallas as pl
from jax.experimental.pallas import tpu as pltpu


def _make_kernel(L, HE, HD, top_k):
    inv_he = 1.0 / float(HE)
    n_bits = max(1, (L - 1).bit_length())

    def kernel(q_ref, k_ref, v_ref, out_ref):
        q = q_ref[...]          # (L, HE) bf16, time-major
        k = k_ref[...]          # (L, HE) bf16, time-major
        v = v_ref[...]          # (L, HD) bf16, time-major

        # ---- (1) period-based dependency discovery --------------------------
        # P[t, i] = <K[t, :], Q[i, :]>  (channels merged) -- bf16 in, f32 acc.
        # NT-form dot_general: no HBM-side transpose of Q needed.
        p = lax.dot_general(k, q, (((1,), (1,)), ((), ())),
                            preferred_element_type=jnp.float32)       # (L, L)

        # mean_value[tau] = (1/HE) * sum_t P[t, (t + tau) mod L]
        # Skew: roll row t LEFT by t using the binary decomposition of t, so
        # circular diagonals become columns; then one sublane reduction.
        row = lax.broadcasted_iota(jnp.int32, (L, 1), 0)               # (L, 1)
        skew = p
        for b in range(n_bits):
            sh = 1 << b
            rolled = jnp.roll(skew, -sh, axis=1)   # out[:, j] = in[:, (j+sh)%L]
            skew = jnp.where((row & sh) != 0, rolled, skew)
        mv = jnp.sum(skew, axis=0, keepdims=True) * inv_he             # (1, L)

        # ---- (2) top-k lag selection + softmax over selected lags -----------
        # Threshold form of top-k (no dynamic index extraction needed).
        cur = mv
        thr = jnp.max(cur, axis=-1, keepdims=True)
        for _ in range(top_k - 1):
            cur = jnp.where(cur >= thr, -jnp.inf, cur)
            thr = jnp.max(cur, axis=-1, keepdims=True)
        sel = mv >= thr                               # top_k lags (ties incl.)
        logits = jnp.where(sel, mv, -1e30)
        mmax = jnp.max(logits, axis=-1, keepdims=True)
        e = jnp.where(sel, jnp.exp(logits - mmax), 0.0)
        w = e / jnp.sum(e, axis=-1, keepdims=True)    # (1, L) sparse softmax

        # ---- (3) time-delay aggregation --------------------------------------
        # agg[t, c] = sum_tau w[tau] * V[(t + tau) mod L, c]  ==  circulant(w) @ V
        # circulant row t = w rolled RIGHT by t (same log-depth skew, in bf16).
        cmat = jnp.broadcast_to(w.astype(jnp.bfloat16), (L, L))
        for b in range(n_bits):
            sh = 1 << b
            rolled = jnp.roll(cmat, sh, axis=1)      # out[:, j] = in[:, (j-sh)%L]
            cmat = jnp.where((row & sh) != 0, rolled, cmat)
        agg = jnp.dot(cmat, v, preferred_element_type=jnp.float32)     # (L, HD)

        out_ref[...] = agg.astype(out_ref.dtype)

    return kernel


def auto_correlation(queries, keys, values, attn_mask=None, *, factor=1):
    """Forward of AutoCorrelation (eval mode, output_attention=False).

    queries: (B, L, H, E), keys: (B, S, H, E), values: (B, S, H, D)
    returns: (V, None) with V of shape (B, L, H, D)
    """
    del attn_mask  # unused by the reference forward
    B, L, H, E = queries.shape
    _, S, _, D = values.shape

    # Align keys/values length to L (reference semantics).
    if L > S:
        values = jnp.concatenate(
            [values, jnp.zeros((B, L - S, H, D), values.dtype)], axis=1)
        keys = jnp.concatenate(
            [keys, jnp.zeros((B, L - S, H, E), keys.dtype)], axis=1)
    else:
        values = values[:, :L]
        keys = keys[:, :L]

    HE = H * E
    HD = H * D
    top_k = max(1, min(L, int(factor * math.log(L))))

    # bf16 operands for the MXU (halves HBM->VMEM DMA); f32 accumulation in-kernel.
    q2 = queries.reshape(B, L, HE).astype(jnp.bfloat16)   # (B, L, HE) time-major
    k2 = keys.reshape(B, L, HE).astype(jnp.bfloat16)      # (B, L, HE)
    v2 = values.reshape(B, L, HD).astype(jnp.bfloat16)    # (B, L, HD)

    kernel = _make_kernel(L, HE, HD, top_k)

    grid_spec = pltpu.PrefetchScalarGridSpec(
        num_scalar_prefetch=0,
        grid=(B,),
        in_specs=[
            pl.BlockSpec((None, L, HE), lambda b: (b, 0, 0)),   # queries
            pl.BlockSpec((None, L, HE), lambda b: (b, 0, 0)),   # keys
            pl.BlockSpec((None, L, HD), lambda b: (b, 0, 0)),   # values
        ],
        out_specs=pl.BlockSpec((None, L, HD), lambda b: (b, 0, 0)),
    )

    # Rough per-step VMEM need: double-buffered bf16 I/O + f32 output block +
    # a few (L, L) f32/bf16 intermediates.  Only raise the scoped limit when
    # the default (16/32 MiB) would be exceeded; cap at v7x's 64 MiB.
    need = (2 * (2 * L * HE * 2 + L * HD * 2) + 2 * L * HD * 4) + 6 * L * L * 4
    vmem_limit = int(min(2 * need, 64 * 1024 * 1024)) if need > (16 << 20) else None

    cost = pl.CostEstimate(
        flops=2 * B * L * L * (HE + HD),
        transcendentals=B * L,
        bytes_accessed=B * (2 * L * HE * 2 + L * HD * 2 + L * HD * 4),
    )

    out = pl.pallas_call(
        kernel,
        out_shape=jax.ShapeDtypeStruct((B, L, HD), jnp.float32),
        grid_spec=grid_spec,
        compiler_params=pltpu.CompilerParams(
            dimension_semantics=("parallel",),
            vmem_limit_bytes=vmem_limit,
        ),
        cost_estimate=cost,
    )(q2, k2, v2)

    V = out.reshape(B, L, H, D)
    # TODO(synk): training-mode branch (batch-shared top-k delays),
    # output_attention=True (full per-channel corr output), odd-L irfft length
    # quirk, and (L,128)-panel tiling of P for very long sequences are not
    # implemented; this kernel implements the inference aggregation path.
    return V, None


if __name__ == "__main__":
    # Small shapes consistent with the module: (B, L, H, E) / (B, S, H, D).
    B, L, H, E = 2, 16, 2, 8
    S, D = L, E
    factor = 1

    key = jax.random.PRNGKey(0)
    kq, kk, kv = jax.random.split(key, 3)
    queries = jax.random.normal(kq, (B, L, H, E), jnp.float32)
    keys = jax.random.normal(kk, (B, S, H, E), jnp.float32)
    values = jax.random.normal(kv, (B, S, H, D), jnp.float32)

    fn = jax.jit(functools.partial(auto_correlation, factor=factor))
    V, attn = fn(queries, keys, values)
    jax.block_until_ready(V)

    assert V.shape == (B, L, H, D)
    assert attn is None
    assert bool(jnp.all(jnp.isfinite(V)))
    print("KERNEL_OK")
</pallas_src>

<mosaic_0001>
module attributes {stable_mosaic.version = 11 : i64} {
  func.func @kernel(%arg0: i32, %arg1: memref<1x16x16xbf16, #tpu.memory_space<vmem>>, %arg2: memref<1x16x16xbf16, #tpu.memory_space<vmem>>, %arg3: memref<1x16x16xbf16, #tpu.memory_space<vmem>>, %arg4: memref<1x16x16xf32, #tpu.memory_space<vmem>>) attributes {dimension_semantics = [#tpu.dimension_semantics<parallel>], iteration_bounds = array<i64: 2>, scalar_prefetch = 0 : i64, scratch_operands = 0 : i64, tpu.core_type = #tpu.core_type<tc>, window_params = [{transform_indices = @transform_0, window_bounds = array<i64: 1, 16, 16>}, {transform_indices = @transform_1, window_bounds = array<i64: 1, 16, 16>}, {transform_indices = @transform_2, window_bounds = array<i64: 1, 16, 16>}, {transform_indices = @transform_3, window_bounds = array<i64: 1, 16, 16>}]} {
    %c0 = arith.constant 0 : index
    %c0_0 = arith.constant 0 : index
    %c0_1 = arith.constant 0 : index
    %0 = vector.load %arg1[%c0, %c0_0, %c0_1] : memref<1x16x16xbf16, #tpu.memory_space<vmem>>, vector<1x16x16xbf16>
    %1 = vector.shape_cast %0 : vector<1x16x16xbf16> to vector<16x16xbf16>
    %c0_2 = arith.constant 0 : index
    %c0_3 = arith.constant 0 : index
    %c0_4 = arith.constant 0 : index
    %2 = vector.load %arg2[%c0_2, %c0_3, %c0_4] : memref<1x16x16xbf16, #tpu.memory_space<vmem>>, vector<1x16x16xbf16>
    %3 = vector.shape_cast %2 : vector<1x16x16xbf16> to vector<16x16xbf16>
    %c0_5 = arith.constant 0 : index
    %c0_6 = arith.constant 0 : index
    %c0_7 = arith.constant 0 : index
    %4 = vector.load %arg3[%c0_5, %c0_6, %c0_7] : memref<1x16x16xbf16, #tpu.memory_space<vmem>>, vector<1x16x16xbf16>
    %5 = vector.shape_cast %4 : vector<1x16x16xbf16> to vector<16x16xbf16>
    %cst = arith.constant dense<0.000000e+00> : vector<16x16xf32>
    %6 = tpu.matmul %3, %1, %cst {dimension_numbers = #tpu.dot_dimension_numbers<[1], [1], [0], [0], [0, 0, 1, 0], [], []>} : vector<16x16xbf16>, vector<16x16xbf16>, vector<16x16xf32> -> vector<16x16xf32>
    %7 = tpu.iota {dimensions = array<i32: 0>} : vector<16x1xi32>
    %8 = vector.extract_strided_slice %6 {offsets = [0, 1], sizes = [16, 15], strides = [1, 1]} : vector<16x16xf32> to vector<16x15xf32>
    %9 = vector.extract_strided_slice %6 {offsets = [0, 0], sizes = [16, 1], strides = [1, 1]} : vector<16x16xf32> to vector<16x1xf32>
    %10 = tpu.concatenate %8, %9 in 1 : vector<16x15xf32>, vector<16x1xf32> -> vector<16x16xf32>
    %c1_i32 = arith.constant 1 : i32
    %11 = vector.broadcast %c1_i32 : i32 to vector<16x1xi32>
    %12 = arith.andi %7, %11 : vector<16x1xi32>
    %c0_i32 = arith.constant 0 : i32
    %13 = vector.broadcast %c0_i32 : i32 to vector<16x1xi32>
    %14 = arith.cmpi ne, %12, %13 : vector<16x1xi32>
    %15 = vector.shape_cast %14 : vector<16x1xi1> to vector<16x1xi1>
    %16 = vector.broadcast %15 : vector<16x1xi1> to vector<16x16xi1>
    %17 = arith.select %16, %10, %6 : vector<16x16xi1>, vector<16x16xf32>
    %18 = vector.extract_strided_slice %17 {offsets = [0, 2], sizes = [16, 14], strides = [1, 1]} : vector<16x16xf32> to vector<16x14xf32>
    %19 = vector.extract_strided_slice %17 {offsets = [0, 0], sizes = [16, 2], strides = [1, 1]} : vector<16x16xf32> to vector<16x2xf32>
    %20 = tpu.concatenate %18, %19 in 1 : vector<16x14xf32>, vector<16x2xf32> -> vector<16x16xf32>
    %c2_i32 = arith.constant 2 : i32
    %21 = vector.broadcast %c2_i32 : i32 to vector<16x1xi32>
    %22 = arith.andi %7, %21 : vector<16x1xi32>
    %c0_i32_8 = arith.constant 0 : i32
    %23 = vector.broadcast %c0_i32_8 : i32 to vector<16x1xi32>
    %24 = arith.cmpi ne, %22, %23 : vector<16x1xi32>
    %25 = vector.shape_cast %24 : vector<16x1xi1> to vector<16x1xi1>
    %26 = vector.broadcast %25 : vector<16x1xi1> to vector<16x16xi1>
    %27 = arith.select %26, %20, %17 : vector<16x16xi1>, vector<16x16xf32>
    %28 = vector.extract_strided_slice %27 {offsets = [0, 4], sizes = [16, 12], strides = [1, 1]} : vector<16x16xf32> to vector<16x12xf32>
    %29 = vector.extract_strided_slice %27 {offsets = [0, 0], sizes = [16, 4], strides = [1, 1]} : vector<16x16xf32> to vector<16x4xf32>
    %30 = tpu.concatenate %28, %29 in 1 : vector<16x12xf32>, vector<16x4xf32> -> vector<16x16xf32>
    %c4_i32 = arith.constant 4 : i32
    %31 = vector.broadcast %c4_i32 : i32 to vector<16x1xi32>
    %32 = arith.andi %7, %31 : vector<16x1xi32>
    %c0_i32_9 = arith.constant 0 : i32
    %33 = vector.broadcast %c0_i32_9 : i32 to vector<16x1xi32>
    %34 = arith.cmpi ne, %32, %33 : vector<16x1xi32>
    %35 = vector.shape_cast %34 : vector<16x1xi1> to vector<16x1xi1>
    %36 = vector.broadcast %35 : vector<16x1xi1> to vector<16x16xi1>
    %37 = arith.select %36, %30, %27 : vector<16x16xi1>, vector<16x16xf32>
    %38 = vector.extract_strided_slice %37 {offsets = [0, 8], sizes = [16, 8], strides = [1, 1]} : vector<16x16xf32> to vector<16x8xf32>
    %39 = vector.extract_strided_slice %37 {offsets = [0, 0], sizes = [16, 8], strides = [1, 1]} : vector<16x16xf32> to vector<16x8xf32>
    %40 = tpu.concatenate %38, %39 in 1 : vector<16x8xf32>, vector<16x8xf32> -> vector<16x16xf32>
    %c8_i32 = arith.constant 8 : i32
    %41 = vector.broadcast %c8_i32 : i32 to vector<16x1xi32>
    %42 = arith.andi %7, %41 : vector<16x1xi32>
    %c0_i32_10 = arith.constant 0 : i32
    %43 = vector.broadcast %c0_i32_10 : i32 to vector<16x1xi32>
    %44 = arith.cmpi ne, %42, %43 : vector<16x1xi32>
    %45 = vector.shape_cast %44 : vector<16x1xi1> to vector<16x1xi1>
    %46 = vector.broadcast %45 : vector<16x1xi1> to vector<16x16xi1>
    %47 = arith.select %46, %40, %37 : vector<16x16xi1>, vector<16x16xf32>
    %cst_11 = arith.constant dense<0.000000e+00> : vector<16xf32>
    %48 = vector.multi_reduction <add>, %47, %cst_11 [0] : vector<16x16xf32> to vector<16xf32>
    %49 = vector.shape_cast %48 : vector<16xf32> to vector<1x16xf32>
    %cst_12 = arith.constant 6.250000e-02 : f32
    %50 = vector.broadcast %cst_12 : f32 to vector<1x16xf32>
    %51 = arith.mulf %49, %50 : vector<1x16xf32>
    %cst_13 = arith.constant dense<0xFF800000> : vector<1xf32>
    %52 = vector.multi_reduction <maximumf>, %51, %cst_13 [1] : vector<1x16xf32> to vector<1xf32>
    %53 = vector.shape_cast %52 : vector<1xf32> to vector<1x1xf32>
    %54 = vector.broadcast %53 : vector<1x1xf32> to vector<1x16xf32>
    %55 = arith.cmpf oge, %51, %54 : vector<1x16xf32>
    %cst_14 = arith.constant 0xFF800000 : f32
    %56 = vector.broadcast %cst_14 : f32 to vector<1x16xf32>
    %57 = arith.select %55, %56, %51 : vector<1x16xi1>, vector<1x16xf32>
    %cst_15 = arith.constant dense<0xFF800000> : vector<1xf32>
    %58 = vector.multi_reduction <maximumf>, %57, %cst_15 [1] : vector<1x16xf32> to vector<1xf32>
    %59 = vector.shape_cast %58 : vector<1xf32> to vector<1x1xf32>
    %60 = vector.broadcast %59 : vector<1x1xf32> to vector<1x16xf32>
    %61 = arith.cmpf oge, %51, %60 : vector<1x16xf32>
    %cst_16 = arith.constant -1.000000e+30 : f32
    %62 = vector.broadcast %cst_16 : f32 to vector<1x16xf32>
    %63 = arith.select %61, %51, %62 : vector<1x16xi1>, vector<1x16xf32>
    %cst_17 = arith.constant dense<0xFF800000> : vector<1xf32>
    %64 = vector.multi_reduction <maximumf>, %63, %cst_17 [1] : vector<1x16xf32> to vector<1xf32>
    %65 = vector.shape_cast %64 : vector<1xf32> to vector<1x1xf32>
    %66 = vector.broadcast %65 : vector<1x1xf32> to vector<1x16xf32>
    %67 = arith.subf %63, %66 : vector<1x16xf32>
    %68 = math.exp %67 : vector<1x16xf32>
    %cst_18 = arith.constant 0.000000e+00 : f32
    %69 = vector.broadcast %cst_18 : f32 to vector<1x16xf32>
    %70 = arith.select %61, %68, %69 : vector<1x16xi1>, vector<1x16xf32>
    %cst_19 = arith.constant dense<0.000000e+00> : vector<1xf32>
    %71 = vector.multi_reduction <add>, %70, %cst_19 [1] : vector<1x16xf32> to vector<1xf32>
    %72 = vector.shape_cast %71 : vector<1xf32> to vector<1x1xf32>
    %73 = vector.broadcast %72 : vector<1x1xf32> to vector<1x16xf32>
    %74 = arith.divf %70, %73 : vector<1x16xf32>
    %75 = arith.truncf %74 : vector<1x16xf32> to vector<1x16xbf16>
    %76 = vector.shape_cast %75 : vector<1x16xbf16> to vector<1x16xbf16>
    %77 = vector.broadcast %76 : vector<1x16xbf16> to vector<16x16xbf16>
    %78 = vector.extract_strided_slice %77 {offsets = [0, 15], sizes = [16, 1], strides = [1, 1]} : vector<16x16xbf16> to vector<16x1xbf16>
    %79 = vector.extract_strided_slice %77 {offsets = [0, 0], sizes = [16, 15], strides = [1, 1]} : vector<16x16xbf16> to vector<16x15xbf16>
    %80 = tpu.concatenate %78, %79 in 1 : vector<16x1xbf16>, vector<16x15xbf16> -> vector<16x16xbf16>
    %c1_i32_20 = arith.constant 1 : i32
    %81 = vector.broadcast %c1_i32_20 : i32 to vector<16x1xi32>
    %82 = arith.andi %7, %81 : vector<16x1xi32>
    %c0_i32_21 = arith.constant 0 : i32
    %83 = vector.broadcast %c0_i32_21 : i32 to vector<16x1xi32>
    %84 = arith.cmpi ne, %82, %83 : vector<16x1xi32>
    %85 = vector.shape_cast %84 : vector<16x1xi1> to vector<16x1xi1>
    %86 = vector.broadcast %85 : vector<16x1xi1> to vector<16x16xi1>
    %87 = arith.select %86, %80, %77 : vector<16x16xi1>, vector<16x16xbf16>
    %88 = vector.extract_strided_slice %87 {offsets = [0, 14], sizes = [16, 2], strides = [1, 1]} : vector<16x16xbf16> to vector<16x2xbf16>
    %89 = vector.extract_strided_slice %87 {offsets = [0, 0], sizes = [16, 14], strides = [1, 1]} : vector<16x16xbf16> to vector<16x14xbf16>
    %90 = tpu.concatenate %88, %89 in 1 : vector<16x2xbf16>, vector<16x14xbf16> -> vector<16x16xbf16>
    %c2_i32_22 = arith.constant 2 : i32
    %91 = vector.broadcast %c2_i32_22 : i32 to vector<16x1xi32>
    %92 = arith.andi %7, %91 : vector<16x1xi32>
    %c0_i32_23 = arith.constant 0 : i32
    %93 = vector.broadcast %c0_i32_23 : i32 to vector<16x1xi32>
    %94 = arith.cmpi ne, %92, %93 : vector<16x1xi32>
    %95 = vector.shape_cast %94 : vector<16x1xi1> to vector<16x1xi1>
    %96 = vector.broadcast %95 : vector<16x1xi1> to vector<16x16xi1>
    %97 = arith.select %96, %90, %87 : vector<16x16xi1>, vector<16x16xbf16>
    %98 = vector.extract_strided_slice %97 {offsets = [0, 12], sizes = [16, 4], strides = [1, 1]} : vector<16x16xbf16> to vector<16x4xbf16>
    %99 = vector.extract_strided_slice %97 {offsets = [0, 0], sizes = [16, 12], strides = [1, 1]} : vector<16x16xbf16> to vector<16x12xbf16>
    %100 = tpu.concatenate %98, %99 in 1 : vector<16x4xbf16>, vector<16x12xbf16> -> vector<16x16xbf16>
    %c4_i32_24 = arith.constant 4 : i32
    %101 = vector.broadcast %c4_i32_24 : i32 to vector<16x1xi32>
    %102 = arith.andi %7, %101 : vector<16x1xi32>
    %c0_i32_25 = arith.constant 0 : i32
    %103 = vector.broadcast %c0_i32_25 : i32 to vector<16x1xi32>
    %104 = arith.cmpi ne, %102, %103 : vector<16x1xi32>
    %105 = vector.shape_cast %104 : vector<16x1xi1> to vector<16x1xi1>
    %106 = vector.broadcast %105 : vector<16x1xi1> to vector<16x16xi1>
    %107 = arith.select %106, %100, %97 : vector<16x16xi1>, vector<16x16xbf16>
    %108 = vector.extract_strided_slice %107 {offsets = [0, 8], sizes = [16, 8], strides = [1, 1]} : vector<16x16xbf16> to vector<16x8xbf16>
    %109 = vector.extract_strided_slice %107 {offsets = [0, 0], sizes = [16, 8], strides = [1, 1]} : vector<16x16xbf16> to vector<16x8xbf16>
    %110 = tpu.concatenate %108, %109 in 1 : vector<16x8xbf16>, vector<16x8xbf16> -> vector<16x16xbf16>
    %c8_i32_26 = arith.constant 8 : i32
    %111 = vector.broadcast %c8_i32_26 : i32 to vector<16x1xi32>
    %112 = arith.andi %7, %111 : vector<16x1xi32>
    %c0_i32_27 = arith.constant 0 : i32
    %113 = vector.broadcast %c0_i32_27 : i32 to vector<16x1xi32>
    %114 = arith.cmpi ne, %112, %113 : vector<16x1xi32>
    %115 = vector.shape_cast %114 : vector<16x1xi1> to vector<16x1xi1>
    %116 = vector.broadcast %115 : vector<16x1xi1> to vector<16x16xi1>
    %117 = arith.select %116, %110, %107 : vector<16x16xi1>, vector<16x16xbf16>
    %cst_28 = arith.constant dense<0.000000e+00> : vector<16x16xf32>
    %118 = tpu.matmul %117, %5, %cst_28 {dimension_numbers = #tpu.dot_dimension_numbers<[1], [0], [0], [1], [0, 0, 1, 1], [], []>} : vector<16x16xbf16>, vector<16x16xbf16>, vector<16x16xf32> -> vector<16x16xf32>
    %c0_29 = arith.constant 0 : index
    %c0_30 = arith.constant 0 : index
    %c0_31 = arith.constant 0 : index
    %119 = vector.load %arg4[%c0_29, %c0_30, %c0_31] : memref<1x16x16xf32, #tpu.memory_space<vmem>>, vector<1x16x16xf32>
    %120 = vector.shape_cast %119 : vector<1x16x16xf32> to vector<16x16xf32>
    %121 = vector.shape_cast %118 : vector<16x16xf32> to vector<1x16x16xf32>
    tpu.vector_store %arg4[%c0_29, %c0_30, %c0_31], %121 {strides = array<i32>} : memref<1x16x16xf32, #tpu.memory_space<vmem>>, vector<1x16x16xf32>,
    return
  }
  func.func @transform_0(%arg0: i32) -> (i32, i32, i32) {
    %c0_i32 = arith.constant 0 : i32
    %c0_i32_0 = arith.constant 0 : i32
    %c0_i32_1 = arith.constant 0 : i32
    return %arg0, %c0_i32, %c0_i32_0 : i32, i32, i32
  }
  func.func @transform_1(%arg0: i32) -> (i32, i32, i32) {
    %c0_i32 = arith.constant 0 : i32
    %c0_i32_0 = arith.constant 0 : i32
    %c0_i32_1 = arith.constant 0 : i32
    return %arg0, %c0_i32, %c0_i32_0 : i32, i32, i32
  }
  func.func @transform_2(%arg0: i32) -> (i32, i32, i32) {
    %c0_i32 = arith.constant 0 : i32
    %c0_i32_0 = arith.constant 0 : i32
    %c0_i32_1 = arith.constant 0 : i32
    return %arg0, %c0_i32, %c0_i32_0 : i32, i32, i32
  }
  func.func @transform_3(%arg0: i32) -> (i32, i32, i32) {
    %c0_i32 = arith.constant 0 : i32
    %c0_i32_0 = arith.constant 0 : i32
    %c0_i32_1 = arith.constant 0 : i32
    return %arg0, %c0_i32, %c0_i32_0 : i32, i32, i32
  }
}

</mosaic_0001>

<bundles_post_ra>
// kernel: auto_correlation.1
= control target key start
LH: loop header
LB: loop body
LE: loop exit
PB: predicated region body
PF: predicated region fallthrough
CT: control target
= control target key end

     0   :  { %s751_s12 = smov 0   ;;  %s858_s0 = inlined_call_operand.vmem [shape: bf16[2,16,16], index: 0, kind: input, shape index: {}]   ;;  %s859_s1 = inlined_call_operand.vmem [shape: bf16[2,16,16], index: 1, kind: input, shape index: {}]   ;;  %s860_s2 = inlined_call_operand.vmem [shape: bf16[2,16,16], index: 2, kind: input, shape index: {}]   ;;  %s861_s3 = inlined_call_operand.vmem [shape: f32[2,16,16], index: 3, kind: output, shape index: {}]  }
   0x1 LB: > { %s628_s13 = sadd.s32 4294967295, %s711_s12   ;;  %p632_p0 = scmp.ge.s32.totalorder %s711_s12, 1  ;;  %s711_s12 = sphi %s751_s12, %s13_s12  }
   0x2   : > { %p157_p1 = scmp.lt.s32.totalorder %s711_s12, 3 }
   0x4   : > { %p158_p2 = pnand %p632_p0, %p157_p1 }
   0x5   : > { %p191_p3 = scmp.lt.s32.totalorder (!%p158_p2), %s628_s13, 1  ;;  %v713_v0 = vmov (!%p158_p2), 0.0   ;;  %vm714_vm0 = vmmov (!%p158_p2), 0   ;;  %vm230_vm1 = vcmask (!%p158_p2), 130048   ;;  %s715_s21 = smov (!%p158_p2), 127   ;;  %v278_v8 = vlaneseq (!%p158_p2) }
   0x6   : > { %161 = sbr.rel (%p158_p2) target bundleno = 2021 (0x7e5), region = 32  ;;  %660 = vmatprep.subr.bf16.mxu0 (!%p158_p2), %v713_v0  ;;  %662 = vmatprep.mubr.msk.bf16.mxu0 (!%p158_p2), %vm714_vm0, %v713_v0  ;;  %s716_s22 = smov (!%p158_p2), 15   ;;  %vm295_vm3 = vcmask (!%p158_p2), 121856   ;;  %vm322_vm5 = vcmask (!%p158_p2), 113664   ;;  %vm349_vm8 = vcmask (!%p158_p2), 97280   ;;  %vm376_vm11 = vcmask (!%p158_p2), 64512  }
   0x7   : > { %666 = vmatprep.subr.bf16.mxu1 (!%p158_p2), %v713_v0  ;;  %668 = vmatprep.mubr.msk.bf16.mxu1 (!%p158_p2), %vm714_vm0, %v713_v0  ;;  %v279_v9 = vshrl.u32 (!%p158_p2), %v278_v8, 7  ;;  %s717_s23 = smov (!%p158_p2), 14   ;;  %s718_s24 = smov (!%p158_p2), 126  }
   0x8   : > { %s719_s25 = smov (!%p158_p2), 12   ;;  %s720_s26 = smov (!%p158_p2), 124  }
   0x9   : > { %v280_v10 = vadd.s32 (!%p158_p2), 8, %v279_v9  ;;  %v298_v15 = vand.u32 (!%p158_p2), 1, %v279_v9  ;;  %v325_v25 = vand.u32 (!%p158_p2), 2, %v279_v9  ;;  %s721_s27 = smov (!%p158_p2), 8   ;;  %s722_s28 = smov (!%p158_p2), 120   ;;  %v352_v41 = vand.u32 (!%p158_p2), 4, %v279_v9 }
   0xa   : > { %s723_s29 = smov (!%p158_p2), 1   ;;  %s724_s30 = smov (!%p158_p2), 113  }
   0xb   : > { %v299_v12 = vand.u32 (!%p158_p2), 1, %v280_v10  ;;  %vm782_vm4 = vcmp.ne.s32.totalorder (!%p158_p2), %v298_v15, 0  ;;  %v326_v23 = vand.u32 (!%p158_p2), 2, %v280_v10  ;;  %vm794_vm7 = vcmp.ne.s32.totalorder (!%p158_p2), %v325_v25, 0  ;;  %s726_s4 = smov (!%p158_p2), 114   ;;  %s727_s5 = smov (!%p158_p2), 2  }
   0xc   : > { %v353_v35 = vand.u32 (!%p158_p2), 4, %v280_v10  ;;  %vm808_vm10 = vcmp.ne.s32.totalorder (!%p158_p2), %v352_v41, 0  ;;  %vm432_vm15 = vmpackc.low (!%p158_p2), %vm782_vm4, %vm782_vm4  ;;  %s728_s9 = smov (!%p158_p2), 4   ;;  %s729_s10 = smov (!%p158_p2), 116  }
   0xd   : > { %s875_s13 = smov (!%p191_p3, %s628_s13), 1  ;;  %vm776_vm2 = vcmp.ne.s32.totalorder %v299_v12, 0  ;;  %vm788_vm6 = vcmp.ne.s32.totalorder %v326_v23, 0 }
   0xe   : > { %s764_s14 = sshll.u32 %s875_s13, 3  ;;  %vm800_vm9 = vcmp.ne.s32.totalorder %v353_v35, 0  ;;  %vm433_vm14 = vmpackc.low %vm776_vm2, %vm776_vm2  ;;  %s655_s11 = sshll.u32 %s875_s13, 4 }
   0xf   : > { %s195_s17 = scalar_lea.vmem %s858_s0, %s764_s14  ;;  %s200_s20 = scalar_lea.vmem %s859_s1, %s764_s14 }
  0x10   : > { %v698_v1 = vld [vmem:[%s195_s17] sm:$0xff]   ;;  %s205_s8 = scalar_lea.vmem %s860_s2, %s764_s14  ;;  %s210_s16 = scalar_lea.vmem %s861_s3, %s655_s11 }
  0x11   : > { %v235_v2 = vsel %vm230_vm1, %v698_v1, 0  ;;  %v699_v3 = vld [vmem:[%s200_s20] sm:$0xff]  }
  0x12   : > { %661 = vmatpush3.bf16.xpose.msra.mxu0 %v235_v2  ;;  %v700_v23 = vld [vmem:[%s205_s8] sm:$0xff]  }
  0x13   : > { %667 = vmatpush3.bf16.msra.mxu1 %v700_v23 }
  0x19   : > { %663 = vmatmul.mubr.msk.bf16.vlgmr.msra.gmra.mrb[0].mxu0 %vm230_vm1, %v699_v3 }
  0xec   : > { %v271_v4 = vpop.f32.mrb[0].mxu0 }
  0xed   : > { %283 = vrot.lane.b32.xlu1 %v271_v4, %s715_s21  ;;  %v664_v5 = vpop.f32.mrb[1].mxu0 }
  0xee   : > { %v274_v6 = vpop.f32.mrb[2].mxu0 }
  0xef   : > { %285 = vrot.lane.b32.xlu0 %v274_v6, %s715_s21  ;;  %v665_v7 = vpop.f32.mrb[3].mxu0 }
  0xf1   : > { %289 = vrot.lane.b32.xlu1 %v271_v4, %s716_s22 }
  0xf3   : > { %291 = vrot.lane.b32.xlu0 %v274_v6, %s716_s22 }
 0x15f   : > { %v284_v11 = vpop.permute.xlu1 %283 }
 0x161   : > { %v286_v13 = vpop.permute.xlu0 %285 }
 0x163   : > { %v290_v16 = vpop.permute.xlu1 %289 }
 0x164   : > { %v296_v20 = vsel %vm295_vm3, %v284_v11, %v290_v16 }
 0x165   : > { %v292_v17 = vpop.permute.xlu0 %291  ;;  %v306_v22 = vsel %vm782_vm4, %v296_v20, %v271_v4  ;;  %vm451_vm4 = vmpackc.low %vm794_vm7, %vm794_vm7 }
 0x166   : > { %v297_v18 = vsel %vm295_vm3, %v286_v13, %v292_v17  ;;  %v725_v13 = vmov 0   ;;  %vm427_vm3 = vcmask 7168  }
 0x167   : > { %v307_v19 = vsel %vm776_vm2, %v297_v18, %v274_v6  ;;  %v434_v15 = vsel %vm432_vm15, 65537, %v725_v13  ;;  %v435_v16 = vsel %vm433_vm14, 65537, %v725_v13  ;;  %vm452_vm2 = vmpackc.low %vm788_vm6, %vm788_vm6  ;;  %v453_v14 = vsel %vm451_vm4, 65537, %v725_v13 }
 0x168   : > { %318 = vrot.lane.b32.xlu1 %v307_v19, %s717_s23  ;;  %312 = vrot.lane.b32.xlu0 %v307_v19, %s718_s24  ;;  %v644_v17 = vcombine.low %v434_v15, %v435_v16  ;;  %v454_v21 = vsel %vm452_vm2, 65537, %v725_v13  ;;  %vm730_vm15 = vmmov 1  }
 0x169   : > { %v645_v25 = vcombine.low %v453_v14, %v454_v21 }
 0x16c   : > { %316 = vrot.lane.b32.xlu1 %v306_v22, %s717_s23  ;;  %310 = vrot.lane.b32.xlu0 %v306_v22, %s718_s24 }
 0x1da   : > { %v319_v26 = vpop.permute.xlu1 %318  ;;  %v313_v27 = vpop.permute.xlu0 %312 }
 0x1db   : > { %v324_v28 = vsel %vm322_vm5, %v313_v27, %v319_v26 }
 0x1dc   : > { %v334_v29 = vsel %vm788_vm6, %v324_v28, %v307_v19  ;;  %vm471_vm6 = vmpackc.low %vm800_vm9, %vm800_vm9 }
 0x1dd   : > { %345 = vrot.lane.b32.xlu1 %v334_v29, %s719_s25  ;;  %339 = vrot.lane.b32.xlu0 %v334_v29, %s720_s26  ;;  %v473_v30 = vsel %vm471_vm6, 65537, %v725_v13 }
 0x1de   : > { %v317_v31 = vpop.permute.xlu1 %316  ;;  %v311_v32 = vpop.permute.xlu0 %310 }
 0x1df   : > { %v323_v33 = vsel %vm322_vm5, %v311_v32, %v317_v31  ;;  %vm439_vm5 = vcmp.ne.s16.totalorder %v644_v17, 0 }
 0x1e0   : > { %v333_v34 = vsel %vm794_vm7, %v323_v33, %v306_v22  ;;  %vm470_vm7 = vmpackc.low %vm808_vm10, %vm808_vm10 }
 0x1e1   : > { %343 = vrot.lane.b32.xlu1 %v333_v34, %s719_s25  ;;  %337 = vrot.lane.b32.xlu0 %v333_v34, %s720_s26 }
 0x24f   : > { %v346_v37 = vpop.permute.xlu1 %345  ;;  %v340_v38 = vpop.permute.xlu0 %339 }
 0x250   : > { %v351_v39 = vsel %vm349_vm8, %v340_v38, %v346_v37 }
 0x251   : > { %v361_v40 = vsel %vm800_vm9, %v351_v39, %v334_v29  ;;  %v472_v29 = vsel %vm470_vm7, 65537, %v725_v13  ;;  %vm488_vm9 = vmpackc.low %vm714_vm0, %vm714_vm0 }
 0x252   : > { %372 = vrot.lane.b32.xlu1 %v361_v40, %s721_s27  ;;  %366 = vrot.lane.b32.xlu0 %v361_v40, %s722_s28  ;;  %v646_v31 = vcombine.low %v472_v29, %v473_v30  ;;  %v490_v36 = vsel %vm488_vm9, 65537, %v725_v13 }
 0x253   : > { %v344_v42 = vpop.permute.xlu1 %343  ;;  %v338_v43 = vpop.permute.xlu0 %337 }
 0x254   : > { %v350_v45 = vsel %vm349_vm8, %v338_v43, %v344_v42  ;;  %vm446_vm8 = vcmask 15360   ;;  %vm477_vm14 = vcmp.ne.s16.totalorder %v646_v31, 0 }
 0x255   : > { %v360_v46 = vsel %vm808_vm10, %v350_v45, %v333_v34 }
 0x256   : > { %v389_v50 = vsel %vm230_vm1, %v360_v46, 0.0 }
 0x2c4   : > { %v373_v47 = vpop.permute.xlu1 %372  ;;  %v367_v48 = vpop.permute.xlu0 %366 }
 0x2c5   : > { %v378_v49 = vsel %vm376_vm11, %v367_v48, %v373_v47 }
 0x2c6   : > { %v390_v51 = vsel %vm230_vm1, %v378_v49, 0.0 }
 0x2c7   : > { %v391_v52 = vadd.f32 %v390_v51, %v389_v50 }
 0x2c9   : > { %v392_v53 = vrot.slane %v391_v52, 4 }
 0x2cb   : > { %v393_v54 = vadd.f32 %v392_v53, %v391_v52 }
 0x2cd   : > { %v394_v55 = vrot.slane %v393_v54, 2 }
 0x2cf   : > { %v395_v56 = vadd.f32 %v394_v55, %v393_v54 }
 0x2d1   : > { %v396_v57 = vrot.slane %v395_v56, 1 }
 0x2d3   : > { %v397_v58 = vadd.f32 %v396_v57, %v395_v56 }
 0x2d5   : > { %v398_v59 = vmul.f32 0.0625, %v397_v58 }
 0x2d7   : > { %v399_v60 = vsel %vm230_vm1, %v398_v59, -inf }
 0x2d8   : > { %400 = vmax.xlane.f32.xlu0 %v399_v60 }
 0x365   : > { %v401_v61 = vpop.xlane.xlu0 %400 }
 0x366   : > { %vm402_vm12 = vcmp.ge.f32.partialorder %v398_v59, %v401_v61 }
 0x367   : > { %v403_v62 = vsel %vm402_vm12, -inf, %v398_v59  ;;  %vm458_vm12 = vcmp.ne.s16.totalorder %v645_v25, 0 }
 0x368   : > { %v404_v63 = vsel %vm230_vm1, %v403_v62, -inf }
 0x369   : > { %405 = vmax.xlane.f32.xlu1 %v404_v63 }
 0x3f6   : > { %v406_v0 = vpop.xlane.xlu1 %405 }
 0x3f7   : > { %vm407_vm13 = vcmp.ge.f32.partialorder %v398_v59, %v406_v0 }
 0x3f8   : > { %v408_v1 = vsel %vm407_vm13, %v398_v59, -1e+30 }
 0x3f9   : > { %v409_v2 = vsel %vm230_vm1, %v408_v1, -inf }
 0x3fa   : > { %410 = vmax.xlane.f32.xlu0 %v409_v2 }
 0x487   : > { %v411_v3 = vpop.xlane.xlu0 %410 }
 0x488   : > { %v412_v4 = vsub.f32 %v408_v1, %v411_v3 }
 0x48a   : > { %v413_v5 = vmul.f32 1.442695, %v412_v4 }
 0x48c   : > { %701 = vpow2.f32 %v413_v5 }
 0x496   : > { %v702_v6 = vpop.eup %701 }
 0x497   : > { %v415_v7 = vsel %vm407_vm13, %v702_v6, 0.0  ;;  %vm465_vm13 = vcmask 31744  }
 0x498   : > { %v416_v8 = vsel %vm230_vm1, %v415_v7, 0.0 }
 0x499   : > { %417 = vadd.xlane.f32.xlu0 %v416_v8 }
 0x526   : > { %v418_v9 = vpop.xlane.xlu0 %417 }
 0x527   : > { %703 = vrcp.f32 %v418_v9 }
 0x531   : > { %v704_v10 = vpop.eup %703 }
 0x532   : > { %v420_v11 = vmul.f32 %v704_v10, %v415_v7 }
 0x534   : > { %v421_v12 = vpack.c.bf16 %v420_v11, %v420_v11 }
 0x536   : > { %425 = vrot.lane.b32.xlu0 %v421_v12, %s723_s29  ;;  %423 = vrot.lane.b32.xlu1 %v421_v12, %s724_s30 }
 0x5a8   : > { %v426_v18 = vpop.permute.xlu0 %425  ;;  %v424_v19 = vpop.permute.xlu1 %423 }
 0x5a9   : > { %v430_v20 = vsel %vm427_vm3, %v424_v19, %v426_v18  ;;  %vm489_vm3 = vmpackc.low %vm730_vm15, %vm730_vm15 }
 0x5aa   : > { %v440_v22 = vsel %vm439_vm5, %v430_v20, %v421_v12  ;;  %v491_v37 = vsel %vm489_vm3, 65537, %v725_v13 }
 0x5ab   : > { %442 = vrot.lane.b32.xlu1 %v440_v22, %s726_s4  ;;  %v647_v38 = vcombine.low %v490_v36, %v491_v37 }
 0x5ad   : > { %vm495_vm10 = vcmp.ne.s16.totalorder %v647_v38, 0 }
 0x5af   : > { %444 = vrot.lane.b32.xlu1 %v440_v22, %s727_s5 }
 0x61d   : > { %v443_v26 = vpop.permute.xlu1 %442 }
 0x621   : > { %v445_v27 = vpop.permute.xlu1 %444 }
 0x622   : > { %v449_v24 = vsel %vm446_vm8, %v443_v26, %v445_v27 }
 0x623   : > { %v459_v28 = vsel %vm458_vm12, %v449_v24, %v440_v22 }
 0x624   : > { %463 = vrot.lane.b32.xlu1 %v459_v28, %s728_s9  ;;  %461 = vrot.lane.b32.xlu0 %v459_v28, %s729_s10 }
 0x696   : > { %v464_v32 = vpop.permute.xlu1 %463  ;;  %v462_v33 = vpop.permute.xlu0 %461 }
 0x697   : > { %v468_v34 = vsel %vm465_vm13, %v462_v33, %v464_v32 }
 0x698   : > { %v478_v35 = vsel %vm477_vm14, %v468_v34, %v459_v28 }
 0x699   : > { %482 = vrot.lane.b32.xlu1 %v478_v35, %s721_s27  ;;  %480 = vrot.lane.b32.xlu0 %v478_v35, %s722_s28 }
 0x70b   : > { %v483_v39 = vpop.permute.xlu1 %482  ;;  %v481_v40 = vpop.permute.xlu0 %480 }
 0x70c   : > { %v486_v41 = vsel %vm376_vm11, %v481_v40, %v483_v39 }
 0x70d   : > { %v496_v42 = vsel %vm495_vm10, %v486_v41, %v478_v35 }
 0x70e   : > { %669 = vmatmul.mubr.msk.bf16.vlgmr.msra.gmra.mrb[0].mxu1 %vm230_vm1, %v496_v42 }
 0x7e1   : > { %v540_v43 = vpop.f32.mrb[0].mxu1 }
 0x7e2   : > { %547 = vst.msk [vmem:[%s210_s16] sm:$0xff] %vm230_vm1, %v540_v43  ;;  %v670_v44 = vpop.f32.mrb[1].mxu1 }
 0x7e3   : > { %v543_v45 = vpop.f32.mrb[2].mxu1 }
 0x7e4   : > { %548 = vst.msk [vmem:[%s210_s16 + $0x8] sm:$0xff] %vm230_vm1, %v543_v45  ;;  %v671_v46 = vpop.f32.mrb[3].mxu1 }
 0x7e5 PF: > { %s13_s12 = sadd.s32 1, %s711_s12  }
 0x7e6   : > { %p10_p4 = scmp.ge.s32.totalorder %s13_s12, 4  }
 0x7e8   :  { %12 = sbr.rel (!%p10_p4) target bundleno = 1 (0x1), region = 68 }

</bundles_post_ra>
